<compile_context>
chip_gen: v7x
topology: tpu7x:2x2x1
jax: 0.10.0
libtpu: 0.0.40
codegen_flags: <defaults>
</compile_context>

<pallas_src>
import functools

import jax
import jax.numpy as jnp
from jax.experimental import pallas as pl
from jax.experimental.pallas import tpu as pltpu

D_IN, D_HID, D_OUT = 512, 256, 128


def encoder_kernel(x_ref, w1_ref, b1_ref, w2_ref, b2_ref, o_ref):
    # x_ref: (TB, 512) f32   w1_ref: (512, 256) bf16   b1_ref: (1, 256) f32
    # w2_ref: (256, 128) bf16 b2_ref: (1, 128) f32     o_ref: (TB, 128) f32/bf16
    # Cast x to bf16 in-kernel (VPU cast on data already in VMEM; no HBM round trip).
    x = x_ref[...].astype(jnp.bfloat16)
    # First GEMM: bf16 x bf16 -> f32 accumulation on the MXU.
    h = jnp.dot(x, w1_ref[...], preferred_element_type=jnp.float32)
    # Bias + ReLU in f32 on the VPU.
    h = jnp.maximum(h + b1_ref[...], 0.0)
    # Second GEMM: activations back to bf16, f32 accumulation.
    y = jnp.dot(h.astype(jnp.bfloat16), w2_ref[...],
                preferred_element_type=jnp.float32)
    o_ref[...] = (y + b2_ref[...]).astype(o_ref.dtype)


def _pick_block(batch, block_b):
    """Batch tile: full batch if it fits, else block_b rounded down to a multiple of 16
    (keeps the (8,128) tiling rule and bf16 sublane packing happy).
    On v7x, callers should pick block_b ~ B//4 (even #steps, >=2 per TensorCore)."""
    if block_b >= batch:
        return batch
    return max(16, (block_b // 16) * 16)


@functools.partial(jax.jit, static_argnames=("block_b", "out_dtype", "x_buffers"))
def autoencoder_forward(x, w1_bf, b1, w2_bf, b2, *, block_b=1024,
                        out_dtype=jnp.float32, x_buffers=2):
    """x: (B, 512) f32. w1_bf/w2_bf: bf16 weights (from prepare_params). b1/b2: f32."""
    B = x.shape[0]
    block = _pick_block(B, block_b)
    grid = (pl.cdiv(B, block),)

    # x tile spec; only request non-default buffering when asked (default path is the
    # stock, known-good double buffering).
    if x_buffers != 2:
        x_spec = pl.BlockSpec((block, D_IN), lambda i: (i, 0),
                              pipeline_mode=pl.Buffered(x_buffers))
    else:
        x_spec = pl.BlockSpec((block, D_IN), lambda i: (i, 0))

    out_bytes = jnp.dtype(out_dtype).itemsize
    flops = 2 * B * (D_IN * D_HID + D_HID * D_OUT)
    bytes_accessed = (
        B * D_IN * 4                # x read once, f32
        + D_IN * D_HID * 2          # W1 (bf16, resident)
        + D_HID * D_OUT * 2         # W2 (bf16, resident)
        + (D_HID + D_OUT) * 4       # biases (f32)
        + B * D_OUT * out_bytes     # output
    )

    return pl.pallas_call(
        encoder_kernel,
        out_shape=jax.ShapeDtypeStruct((B, D_OUT), out_dtype),
        grid_spec=pltpu.PrefetchScalarGridSpec(
            num_scalar_prefetch=0,
            grid=grid,
            in_specs=[
                x_spec,                                           # x tile (f32)
                pl.BlockSpec((D_IN, D_HID), lambda i: (0, 0)),    # W1 (resident)
                pl.BlockSpec((1, D_HID), lambda i: (0, 0)),       # b1
                pl.BlockSpec((D_HID, D_OUT), lambda i: (0, 0)),   # W2 (resident)
                pl.BlockSpec((1, D_OUT), lambda i: (0, 0)),       # b2
            ],
            out_specs=pl.BlockSpec((block, D_OUT), lambda i: (i, 0)),
        ),
        compiler_params=pltpu.CompilerParams(
            dimension_semantics=("parallel",),
            vmem_limit_bytes=32 * 1024 * 1024,   # raise v5e's 16 MiB default; OK on v7x
        ),
        cost_estimate=pl.CostEstimate(
            flops=flops, transcendentals=0, bytes_accessed=bytes_accessed),
    )(x, w1_bf, b1, w2_bf, b2)


def init_params(key):
    """Deterministic init mimicking PyTorch Linear default (U[-1/sqrt(fan_in), +])."""
    k1, k2, k3, k4 = jax.random.split(key, 4)
    lim1 = 1.0 / jnp.sqrt(jnp.float32(D_IN))
    lim2 = 1.0 / jnp.sqrt(jnp.float32(D_HID))
    # Stored as (in, out) so the kernel computes x @ W + b (same math as x @ W.T with
    # PyTorch's (out, in) storage).
    w1 = jax.random.uniform(k1, (D_IN, D_HID), jnp.float32, -lim1, lim1)
    b1 = jax.random.uniform(k2, (1, D_HID), jnp.float32, -lim1, lim1)
    w2 = jax.random.uniform(k3, (D_HID, D_OUT), jnp.float32, -lim2, lim2)
    b2 = jax.random.uniform(k4, (1, D_OUT), jnp.float32, -lim2, lim2)
    return w1, b1, w2, b2


def prepare_params(w1, b1, w2, b2):
    """One-time conversion of weights to bf16 (done OUTSIDE the jit so the cast cost is
    paid once, not per forward call). Biases stay f32."""
    return (jnp.asarray(w1, jnp.bfloat16), jnp.asarray(b1, jnp.float32),
            jnp.asarray(w2, jnp.bfloat16), jnp.asarray(b2, jnp.float32))


def _reference(x, w1_bf, b1, w2_bf, b2):
    # Same numerics as the kernel: bf16 matmul operands, f32 accumulation, f32 bias/ReLU.
    x_bf = x.astype(jnp.bfloat16)
    h = jnp.dot(x_bf, w1_bf, preferred_element_type=jnp.float32)
    h = jnp.maximum(h + b1, 0.0)
    y = jnp.dot(h.astype(jnp.bfloat16), w2_bf, preferred_element_type=jnp.float32)
    return y + b2


if __name__ == "__main__":
    key = jax.random.PRNGKey(0)
    kx, kp = jax.random.split(key)
    w1, b1, w2, b2 = init_params(kp)
    w1_bf, b1_f, w2_bf, b2_f = prepare_params(w1, b1, w2, b2)   # outside jit, once

    # 1) Small-shape correctness check (single grid step; block clamps to B).
    batch = 16
    x_small = jax.random.normal(kx, (batch, D_IN), jnp.float32)
    out_small = jax.block_until_ready(
        autoencoder_forward(x_small, w1_bf, b1_f, w2_bf, b2_f))
    ref_small = _reference(x_small, w1_bf, b1_f, w2_bf, b2_f)
    assert out_small.shape == (batch, D_OUT)
    assert out_small.dtype == jnp.float32
    assert jnp.allclose(out_small, ref_small, atol=1e-2, rtol=1e-2)

    # 2) Multi-step grid with a NON-multiple batch (exercises the masked partial tile):
    #    B=72, block=32 -> 3 grid steps, last tile has 8 valid rows.
    batch_ragged = 72
    x_rag = jax.random.normal(kx, (batch_ragged, D_IN), jnp.float32)
    out_rag = jax.block_until_ready(
        autoencoder_forward(x_rag, w1_bf, b1_f, w2_bf, b2_f, block_b=32))
    ref_rag = _reference(x_rag, w1_bf, b1_f, w2_bf, b2_f)
    assert out_rag.shape == (batch_ragged, D_OUT)
    assert jnp.allclose(out_rag, ref_rag, atol=1e-2, rtol=1e-2)

    # 3) Optional bf16-output path (bandwidth saver for downstream bf16 consumers).
    out_bf = jax.block_until_ready(
        autoencoder_forward(x_small, w1_bf, b1_f, w2_bf, b2_f,
                            out_dtype=jnp.bfloat16))
    assert out_bf.dtype == jnp.bfloat16
    assert jnp.allclose(out_bf.astype(jnp.float32), ref_small, atol=5e-2, rtol=5e-2)

    print("KERNEL_OK")
</pallas_src>

<mosaic_0001>
module attributes {stable_mosaic.version = 11 : i64} {
  func.func @encoder_kernel(%arg0: i32, %arg1: memref<16x512xf32, #tpu.memory_space<vmem>>, %arg2: memref<512x256xbf16, #tpu.memory_space<vmem>>, %arg3: memref<1x256xf32, #tpu.memory_space<vmem>>, %arg4: memref<256x128xbf16, #tpu.memory_space<vmem>>, %arg5: memref<1x128xf32, #tpu.memory_space<vmem>>, %arg6: memref<16x128xf32, #tpu.memory_space<vmem>>) attributes {dimension_semantics = [#tpu.dimension_semantics<parallel>], iteration_bounds = array<i64: 1>, scalar_prefetch = 0 : i64, scratch_operands = 0 : i64, tpu.core_type = #tpu.core_type<tc>, window_params = [{transform_indices = @transform_0, window_bounds = array<i64: 16, 512>}, {pipeline_mode = #tpu.pipeline_mode<synchronous>, transform_indices = @transform_1, window_bounds = array<i64: 512, 256>}, {pipeline_mode = #tpu.pipeline_mode<synchronous>, transform_indices = @transform_2, window_bounds = array<i64: 1, 256>}, {pipeline_mode = #tpu.pipeline_mode<synchronous>, transform_indices = @transform_3, window_bounds = array<i64: 256, 128>}, {pipeline_mode = #tpu.pipeline_mode<synchronous>, transform_indices = @transform_4, window_bounds = array<i64: 1, 128>}, {transform_indices = @transform_5, window_bounds = array<i64: 16, 128>}]} {
    %c0 = arith.constant 0 : index
    %c0_0 = arith.constant 0 : index
    %0 = vector.load %arg1[%c0, %c0_0] : memref<16x512xf32, #tpu.memory_space<vmem>>, vector<16x512xf32>
    %1 = arith.truncf %0 : vector<16x512xf32> to vector<16x512xbf16>
    %c0_1 = arith.constant 0 : index
    %c0_2 = arith.constant 0 : index
    %2 = vector.load %arg2[%c0_1, %c0_2] : memref<512x256xbf16, #tpu.memory_space<vmem>>, vector<512x256xbf16>
    %cst = arith.constant dense<0.000000e+00> : vector<16x256xf32>
    %3 = tpu.matmul %1, %2, %cst {dimension_numbers = #tpu.dot_dimension_numbers<[1], [0], [0], [1], [0, 0, 1, 1], [], []>} : vector<16x512xbf16>, vector<512x256xbf16>, vector<16x256xf32> -> vector<16x256xf32>
    %c0_3 = arith.constant 0 : index
    %c0_4 = arith.constant 0 : index
    %4 = vector.load %arg3[%c0_3, %c0_4] : memref<1x256xf32, #tpu.memory_space<vmem>>, vector<1x256xf32>
    %5 = vector.broadcast %4 : vector<1x256xf32> to vector<16x256xf32>
    %6 = arith.addf %3, %5 : vector<16x256xf32>
    %cst_5 = arith.constant 0.000000e+00 : f32
    %7 = vector.broadcast %cst_5 : f32 to vector<16x256xf32>
    %8 = arith.maximumf %6, %7 : vector<16x256xf32>
    %9 = arith.truncf %8 : vector<16x256xf32> to vector<16x256xbf16>
    %c0_6 = arith.constant 0 : index
    %c0_7 = arith.constant 0 : index
    %10 = vector.load %arg4[%c0_6, %c0_7] : memref<256x128xbf16, #tpu.memory_space<vmem>>, vector<256x128xbf16>
    %cst_8 = arith.constant dense<0.000000e+00> : vector<16x128xf32>
    %11 = tpu.matmul %9, %10, %cst_8 {dimension_numbers = #tpu.dot_dimension_numbers<[1], [0], [0], [1], [0, 0, 1, 1], [], []>} : vector<16x256xbf16>, vector<256x128xbf16>, vector<16x128xf32> -> vector<16x128xf32>
    %c0_9 = arith.constant 0 : index
    %c0_10 = arith.constant 0 : index
    %12 = vector.load %arg5[%c0_9, %c0_10] : memref<1x128xf32, #tpu.memory_space<vmem>>, vector<1x128xf32>
    %13 = vector.broadcast %12 : vector<1x128xf32> to vector<16x128xf32>
    %14 = arith.addf %11, %13 : vector<16x128xf32>
    %c0_11 = arith.constant 0 : index
    %c0_12 = arith.constant 0 : index
    %15 = vector.load %arg6[%c0_11, %c0_12] : memref<16x128xf32, #tpu.memory_space<vmem>>, vector<16x128xf32>
    tpu.vector_store %arg6[%c0_11, %c0_12], %14 {strides = array<i32>} : memref<16x128xf32, #tpu.memory_space<vmem>>, vector<16x128xf32>,
    return
  }
  func.func @transform_0(%arg0: i32) -> (i32, i32) {
    %c0_i32 = arith.constant 0 : i32
    %c0_i32_0 = arith.constant 0 : i32
    return %arg0, %c0_i32 : i32, i32
  }
  func.func @transform_1(%arg0: i32) -> (i32, i32) {
    %c0_i32 = arith.constant 0 : i32
    %c0_i32_0 = arith.constant 0 : i32
    %c0_i32_1 = arith.constant 0 : i32
    return %c0_i32, %c0_i32_0 : i32, i32
  }
  func.func @transform_2(%arg0: i32) -> (i32, i32) {
    %c0_i32 = arith.constant 0 : i32
    %c0_i32_0 = arith.constant 0 : i32
    %c0_i32_1 = arith.constant 0 : i32
    return %c0_i32, %c0_i32_0 : i32, i32
  }
  func.func @transform_3(%arg0: i32) -> (i32, i32) {
    %c0_i32 = arith.constant 0 : i32
    %c0_i32_0 = arith.constant 0 : i32
    %c0_i32_1 = arith.constant 0 : i32
    return %c0_i32, %c0_i32_0 : i32, i32
  }
  func.func @transform_4(%arg0: i32) -> (i32, i32) {
    %c0_i32 = arith.constant 0 : i32
    %c0_i32_0 = arith.constant 0 : i32
    %c0_i32_1 = arith.constant 0 : i32
    return %c0_i32, %c0_i32_0 : i32, i32
  }
  func.func @transform_5(%arg0: i32) -> (i32, i32) {
    %c0_i32 = arith.constant 0 : i32
    %c0_i32_0 = arith.constant 0 : i32
    return %arg0, %c0_i32 : i32, i32
  }
}

</mosaic_0001>

<bundles_post_ra>
// kernel: autoencoder_forward.1
= control target key start
LH: loop header
LB: loop body
LE: loop exit
PB: predicated region body
PF: predicated region fallthrough
CT: control target
= control target key end

     0   :  { %10 = vsyncpa [#allocation3], 0  ;;  %s1186_s0 = inlined_call_operand.hbm [shape: f32[16,512], index: 0, kind: input, shape index: {}]   ;;  %s1187_s1 = inlined_call_operand.hbm [shape: bf16[512,256], index: 1, kind: input, shape index: {}]   ;;  %s1188_s2 = inlined_call_operand.vmem [shape: f32[1,256], index: 2, kind: input, shape index: {}]   ;;  %s1189_s3 = inlined_call_operand.hbm [shape: bf16[256,128], index: 3, kind: input, shape index: {}]   ;;  %s1190_s4 = inlined_call_operand.vmem [shape: f32[1,128], index: 4, kind: input, shape index: {}]   ;;  %s1191_s5 = inlined_call_operand.hbm [shape: f32[16,128], index: 5, kind: output, shape index: {}]  }
   0x1   :  { %11 = vsyncpa [#allocation6], 0 }
   0x2   :  { %12 = vsyncpa [#allocation4], 0  ;;  %s1086_s18 = smov [#allocation5]   ;;  %s992_s22 = scalar_lea.hbm %s1187_s1, 8192 }
   0x3   :  { %s30_s19 = sshll.u32 %s1086_s18, 4  ;;  %p993_p0 = scmp.ne.s32.totalorder %s1187_s1, %s992_s22  ;;  %s31_s19 = int_to_ptr.vmem [resolvable:$true] %s30_s19 }
   0x4   :  { %p996_p1 = scmp.lt.u32.totalorder %s992_s22, %s1187_s1 }
   0x6   :  { %p998_p2 = pnand %p996_p1, %p993_p0 }
   0x8   :  { %1001 = shalt.err (!%p998_p2)
}
   0x9   :  { %s1002_s27 = scalar_lea.vmem %s31_s19, 8192  ;;  %p1007_p4 = scmp.lt.s32.totalorder %s31_s19, %s31_s19 }
   0xa   :  { %p1003_p3 = scmp.ne.s32.totalorder %s31_s19, %s1002_s27  ;;  %p1008_p5 = scmp.lt.s32.totalorder %s1002_s27, %s1002_s27 }
   0xc   :  { %p1009_p6 = por %p1008_p5, %p1007_p4 }
   0xe   :  { %p1010_p7 = pnand %p1009_p6, %p1003_p3 }
  0x10   :  { %1013 = shalt.err (!%p1010_p7)
}
  0x11   :  { %s1087_s28 = smov 128   ;;  %s1088_s29 = smov 8  }
  0x12   :  { %36 = dma.hbm_to_vmem [thread:$0]  %s1187_s1, 8192, %s31_s19, [#allocation6], %s1087_s28, %s1087_s28, %s1088_s29  }
  0x13   :  { %s1089_s7 = smov [#allocation2]   ;;  %s1014_s11 = scalar_lea.hbm %s1186_s0, 1024 }
  0x14   :  { %s18_s8 = sshll.u32 %s1089_s7, 4  ;;  %p1015_p8 = scmp.ne.s32.totalorder %s1186_s0, %s1014_s11  ;;  %s19_s8 = int_to_ptr.vmem [resolvable:$true] %s18_s8 }
  0x15   :  { %p1018_p9 = scmp.lt.u32.totalorder %s1014_s11, %s1186_s0 }
  0x17   :  { %p1020_p10 = pnand %p1018_p9, %p1015_p8 }
  0x19   :  { %1023 = shalt.err (!%p1020_p10)
}
  0x1a   :  { %s1024_s16 = scalar_lea.vmem %s19_s8, 1024  ;;  %p1029_p12 = scmp.lt.s32.totalorder %s19_s8, %s19_s8 }
  0x1b   :  { %p1025_p11 = scmp.ne.s32.totalorder %s19_s8, %s1024_s16  ;;  %p1030_p13 = scmp.lt.s32.totalorder %s1024_s16, %s1024_s16 }
  0x1d   :  { %p1031_p0 = por %p1030_p13, %p1029_p12 }
  0x1f   :  { %p1032_p1 = pnand %p1031_p0, %p1025_p11 }
  0x21   :  { %1035 = shalt.err (!%p1032_p1)
}
  0x22   :  { %s1090_s1 = smov 512   ;;  %s1091_s17 = smov 32  }
  0x23   :  { %24 = dma.hbm_to_vmem [thread:$0]  %s1186_s0, 1024, %s19_s8, [#allocation3], %s1090_s1, %s1090_s1, %s1091_s17  }
  0x24   :  { %s1092_s20 = smov [#allocation7]   ;;  %s1036_s24 = scalar_lea.hbm %s1189_s3, 2048 }
  0x25   :  { %s44_s21 = sshll.u32 %s1092_s20, 4  ;;  %p1037_p2 = scmp.ne.s32.totalorder %s1189_s3, %s1036_s24  ;;  %s45_s21 = int_to_ptr.vmem [resolvable:$true] %s44_s21 }
  0x26   :  { %p1040_p3 = scmp.lt.u32.totalorder %s1036_s24, %s1189_s3 }
  0x28   :  { %p1042_p4 = pnand %p1040_p3, %p1037_p2 }
  0x2a   :  { %1045 = shalt.err (!%p1042_p4)
}
  0x2b   :  { %s1046_s6 = scalar_lea.vmem %s45_s21, 2048  ;;  %p1051_p6 = scmp.lt.s32.totalorder %s45_s21, %s45_s21 }
  0x2c   :  { %p1047_p5 = scmp.ne.s32.totalorder %s45_s21, %s1046_s6  ;;  %p1052_p7 = scmp.lt.s32.totalorder %s1046_s6, %s1046_s6 }
  0x2e   :  { %p1053_p8 = por %p1052_p7, %p1051_p6 }
  0x30   :  { %p1054_p9 = pnand %p1053_p8, %p1047_p5 }
  0x32   :  { %1057 = shalt.err (!%p1054_p9)
}
  0x33   :  { %s1093_s0 = smov 64   ;;  %s1094_s7 = smov 4  }
  0x34   :  { %50 = dma.hbm_to_vmem [thread:$0]  %s1189_s3, 2048, %s45_s21, [#allocation6], %s1093_s0, %s1093_s0, %s1094_s7  }
  0x35   :  { %1080 = dma.done.wait [#allocation3], 1024  }
  0x36   :  { %1081 = vsyncadd [#allocation3], 4294966272 }
  0x37   :  { %1082 = dma.done.wait [#allocation6], 10240  }
  0x38   :  { %1083 = vsyncadd [#allocation6], 4294957056  ;;  %v880_v0 = vld [vmem:[#allocation5 + $0x4] ss:$8 sps:$4 sm:$0xff]   ;;  %v884_v2 = vld [vmem:[#allocation5] ss:$8 sps:$4 sm:$0xff]  }
  0x39   :  { %v882_v1 = vld [vmem:[#allocation5 + $0x104] ss:$8 sps:$4 sm:$0xff]   ;;  %471 = vmatprep.subr.bf16.mxu1 %v880_v0  ;;  %v885_v3 = vld [vmem:[#allocation5 + $0x100] ss:$8 sps:$4 sm:$0xff]   ;;  %v886_v4 = vld [vmem:[#allocation5 + $0x14] ss:$8 sps:$4 sm:$0xff]  }
  0x3a   :  { %514 = vmatprep.subr.bf16.mxu0 %v882_v1  ;;  %472 = vmatpush1.bf16.msra.mxu1 %v884_v2  ;;  %v888_v5 = vld [vmem:[#allocation5 + $0x114] ss:$8 sps:$4 sm:$0xff]   ;;  %v890_v6 = vld [vmem:[#allocation5 + $0x10] ss:$8 sps:$4 sm:$0xff]   ;;  %v892_v8 = vld [vmem:[#allocation5 + $0x24] ss:$8 sps:$4 sm:$0xff]  }
  0x3b   :  { %515 = vmatpush1.bf16.msra.mxu0 %v885_v3  ;;  %473 = vmatprep.subr.bf16.mxu1 %v886_v4  ;;  %v891_v7 = vld [vmem:[#allocation5 + $0x110] ss:$8 sps:$4 sm:$0xff]   ;;  %v894_v9 = vld [vmem:[#allocation5 + $0x124] ss:$8 sps:$4 sm:$0xff]   ;;  %v896_v10 = vld [vmem:[#allocation5 + $0x20] ss:$8 sps:$4 sm:$0xff]  }
  0x3c   :  { %516 = vmatprep.subr.bf16.mxu0 %v888_v5  ;;  %v897_v11 = vld [vmem:[#allocation5 + $0x120] ss:$8 sps:$4 sm:$0xff]   ;;  %v898_v12 = vld [vmem:[#allocation5 + $0x34] ss:$8 sps:$4 sm:$0xff]   ;;  %v902_v14 = vld [vmem:[#allocation5 + $0x30] ss:$8 sps:$4 sm:$0xff]  }
  0x3d   :  { %v900_v13 = vld [vmem:[#allocation5 + $0x134] ss:$8 sps:$4 sm:$0xff]   ;;  %v903_v15 = vld [vmem:[#allocation5 + $0x130] ss:$8 sps:$4 sm:$0xff]   ;;  %v904_v16 = vld [vmem:[#allocation5 + $0x44] ss:$8 sps:$4 sm:$0xff]  }
  0x3e   :  { %474 = vmatpush1.bf16.msra.mxu1 %v890_v6  ;;  %v906_v17 = vld [vmem:[#allocation5 + $0x144] ss:$8 sps:$4 sm:$0xff]   ;;  %v908_v18 = vld [vmem:[#allocation5 + $0x40] ss:$8 sps:$4 sm:$0xff]   ;;  %v910_v20 = vld [vmem:[#allocation5 + $0x54] ss:$8 sps:$4 sm:$0xff]  }
  0x3f   :  { %517 = vmatpush1.bf16.msra.mxu0 %v891_v7  ;;  %475 = vmatprep.subr.bf16.mxu1 %v892_v8  ;;  %v909_v19 = vld [vmem:[#allocation5 + $0x140] ss:$8 sps:$4 sm:$0xff]   ;;  %v912_v21 = vld [vmem:[#allocation5 + $0x154] ss:$8 sps:$4 sm:$0xff]   ;;  %v914_v22 = vld [vmem:[#allocation5 + $0x50] ss:$8 sps:$4 sm:$0xff]  }
  0x40   :  { %518 = vmatprep.subr.bf16.mxu0 %v894_v9  ;;  %v915_v23 = vld [vmem:[#allocation5 + $0x150] ss:$8 sps:$4 sm:$0xff]   ;;  %v916_v24 = vld [vmem:[#allocation5 + $0x64] ss:$8 sps:$4 sm:$0xff]   ;;  %v920_v26 = vld [vmem:[#allocation5 + $0x60] ss:$8 sps:$4 sm:$0xff]  }
  0x41   :  { %v918_v25 = vld [vmem:[#allocation5 + $0x164] ss:$8 sps:$4 sm:$0xff]   ;;  %v921_v27 = vld [vmem:[#allocation5 + $0x160] ss:$8 sps:$4 sm:$0xff]   ;;  %v922_v28 = vld [vmem:[#allocation5 + $0x74] ss:$8 sps:$4 sm:$0xff]  }
  0x42   :  { %476 = vmatpush1.bf16.msra.mxu1 %v896_v10  ;;  %v924_v29 = vld [vmem:[#allocation5 + $0x174] ss:$8 sps:$4 sm:$0xff]   ;;  %v926_v30 = vld [vmem:[#allocation5 + $0x70] ss:$8 sps:$4 sm:$0xff]   ;;  %v928_v32 = vld [vmem:[#allocation5 + $0x84] ss:$8 sps:$4 sm:$0xff]  }
  0x43   :  { %519 = vmatpush1.bf16.msra.mxu0 %v897_v11  ;;  %477 = vmatprep.subr.bf16.mxu1 %v898_v12  ;;  %v927_v31 = vld [vmem:[#allocation5 + $0x170] ss:$8 sps:$4 sm:$0xff]   ;;  %v930_v33 = vld [vmem:[#allocation5 + $0x184] ss:$8 sps:$4 sm:$0xff]   ;;  %v932_v34 = vld [vmem:[#allocation5 + $0x80] ss:$8 sps:$4 sm:$0xff]  }
  0x44   :  { %520 = vmatprep.subr.bf16.mxu0 %v900_v13  ;;  %v933_v35 = vld [vmem:[#allocation5 + $0x180] ss:$8 sps:$4 sm:$0xff]   ;;  %v934_v36 = vld [vmem:[#allocation5 + $0x94] ss:$8 sps:$4 sm:$0xff]   ;;  %v938_v38 = vld [vmem:[#allocation5 + $0x90] ss:$8 sps:$4 sm:$0xff]  }
  0x45   :  { %v936_v37 = vld [vmem:[#allocation5 + $0x194] ss:$8 sps:$4 sm:$0xff]   ;;  %v939_v39 = vld [vmem:[#allocation5 + $0x190] ss:$8 sps:$4 sm:$0xff]   ;;  %v940_v40 = vld [vmem:[#allocation5 + $0xa4] ss:$8 sps:$4 sm:$0xff]  }
  0x46   :  { %478 = vmatpush1.bf16.msra.mxu1 %v902_v14  ;;  %v942_v41 = vld [vmem:[#allocation5 + $0x1a4] ss:$8 sps:$4 sm:$0xff]   ;;  %v944_v42 = vld [vmem:[#allocation5 + $0xa0] ss:$8 sps:$4 sm:$0xff]   ;;  %v946_v44 = vld [vmem:[#allocation5 + $0xb4] ss:$8 sps:$4 sm:$0xff]  }
  0x47   :  { %521 = vmatpush1.bf16.msra.mxu0 %v903_v15  ;;  %479 = vmatprep.subr.bf16.mxu1 %v904_v16  ;;  %v945_v43 = vld [vmem:[#allocation5 + $0x1a0] ss:$8 sps:$4 sm:$0xff]   ;;  %v948_v45 = vld [vmem:[#allocation5 + $0x1b4] ss:$8 sps:$4 sm:$0xff]   ;;  %v950_v50 = vld [vmem:[#allocation5 + $0xb0] ss:$8 sps:$4 sm:$0xff]  }
  0x48   :  { %522 = vmatprep.subr.bf16.mxu0 %v906_v17  ;;  %v64_v46 = vld [vmem:[#allocation2 + $0x8] sm:$0xff]  ;;  %v66_v48 = vld [vmem:[#allocation2 + $0x18] sm:$0xff]  ;;  %v63_v6 = vld [vmem:[#allocation2] sm:$0xff]  ;;  %s1095_s12 = smov [#allocation8]  }
  0x49   :  { %v68_v47 = vld [vmem:[#allocation2 + $0x28] sm:$0xff]  ;;  %v70_v49 = vld [vmem:[#allocation2 + $0x38] sm:$0xff]  ;;  %v67_v7 = vld [vmem:[#allocation2 + $0x20] sm:$0xff]  ;;  %s746_s13 = sshll.u32 %s1095_s12, 4  ;;  %s747_s13 = int_to_ptr.vmem [resolvable:$true] %s746_s13 }
  0x4a   :  { %480 = vmatpush1.bf16.msra.mxu1 %v908_v18  ;;  %v951_v51 = vld [vmem:[#allocation5 + $0x1b0] ss:$8 sps:$4 sm:$0xff]   ;;  %v952_v52 = vld [vmem:[#allocation5 + $0xc4] ss:$8 sps:$4 sm:$0xff]   ;;  %v72_v53 = vpack.c.bf16 %v68_v47, %v64_v46  ;;  %v74_v54 = vpack.c.bf16 %v70_v49, %v66_v48  ;;  %v956_v56 = vld [vmem:[#allocation5 + $0xc0] ss:$8 sps:$4 sm:$0xff]   ;;  %v71_v11 = vpack.c.bf16 %v67_v7, %v63_v6  ;;  %p1063_p11 = scmp.lt.s32.totalorder %s747_s13, %s747_s13 }
  0x4b   :  { %523 = vmatpush1.bf16.msra.mxu0 %v909_v19  ;;  %481 = vmatprep.subr.bf16.mxu1 %v910_v20  ;;  %v954_v55 = vld [vmem:[#allocation5 + $0x1c4] ss:$8 sps:$4 sm:$0xff]   ;;  %v957_v57 = vld [vmem:[#allocation5 + $0x1c0] ss:$8 sps:$4 sm:$0xff]   ;;  %v958_v58 = vld [vmem:[#allocation5 + $0xd4] ss:$8 sps:$4 sm:$0xff]  }
  0x4c   :  { %524 = vmatprep.subr.bf16.mxu0 %v912_v21  ;;  %503 = vmatprep.mubr.bf16.mxu1 %v72_v53  ;;  %v960_v59 = vld [vmem:[#allocation5 + $0x1d4] ss:$8 sps:$4 sm:$0xff]   ;;  %v962_v60 = vld [vmem:[#allocation5 + $0xd0] ss:$8 sps:$4 sm:$0xff]   ;;  %v964_v62 = vld [vmem:[#allocation5 + $0xe4] ss:$8 sps:$4 sm:$0xff]  }
  0x4d   :  { %546 = vmatprep.mubr.bf16.mxu0 %v74_v54  ;;  %v963_v61 = vld [vmem:[#allocation5 + $0x1d0] ss:$8 sps:$4 sm:$0xff]   ;;  %v966_v63 = vld [vmem:[#allocation5 + $0x1e4] ss:$8 sps:$4 sm:$0xff]   ;;  %v968_v0 = vld [vmem:[#allocation5 + $0xe0] ss:$8 sps:$4 sm:$0xff]  }
  0x4e   :  { %482 = vmatpush1.bf16.msra.mxu1 %v914_v22  ;;  %v969_v1 = vld [vmem:[#allocation5 + $0x1e0] ss:$8 sps:$4 sm:$0xff]   ;;  %v970_v2 = vld [vmem:[#allocation5 + $0xf4] ss:$8 sps:$4 sm:$0xff]   ;;  %v974_v4 = vld [vmem:[#allocation5 + $0xf0] ss:$8 sps:$4 sm:$0xff]  }
  0x4f   :  { %525 = vmatpush1.bf16.msra.mxu0 %v915_v23  ;;  %483 = vmatprep.subr.bf16.mxu1 %v916_v24  ;;  %v972_v3 = vld [vmem:[#allocation5 + $0x1f4] ss:$8 sps:$4 sm:$0xff]   ;;  %v975_v5 = vld [vmem:[#allocation5 + $0x1f0] ss:$8 sps:$4 sm:$0xff]   ;;  %v976_v10 = vld [vmem:[#allocation7 + $0x40] sm:$0xff]   ;;  %s1058_s14 = scalar_lea.vmem %s747_s13, 256 }
  0x50   :  { %526 = vmatprep.subr.bf16.mxu0 %v918_v25  ;;  %v65_v8 = vld [vmem:[#allocation2 + $0x10] sm:$0xff]  ;;  %v977_v13 = vld [vmem:[#allocation7] sm:$0xff]   ;;  %v978_v14 = vld [vmem:[#allocation7 + $0x48] sm:$0xff]   ;;  %p1059_p10 = scmp.ne.s32.totalorder %s747_s13, %s1058_s14  ;;  %p1064_p12 = scmp.lt.s32.totalorder %s1058_s14, %s1058_s14 }
  0x51   :  { %v69_v9 = vld [vmem:[#allocation2 + $0x30] sm:$0xff]  ;;  %v979_v15 = vld [vmem:[#allocation7 + $0x8] sm:$0xff]   ;;  %v982_v18 = vld [vmem:[#allocation7 + $0x58] sm:$0xff]  }
  0x52   :  { %484 = vmatpush1.bf16.msra.mxu1 %v920_v26  ;;  %v73_v12 = vpack.c.bf16 %v69_v9, %v65_v8  ;;  %v980_v16 = vld [vmem:[#allocation7 + $0x50] sm:$0xff]   ;;  %v983_v19 = vld [vmem:[#allocation7 + $0x18] sm:$0xff]   ;;  %v984_v20 = vld [vmem:[#allocation7 + $0x60] sm:$0xff]   ;;  %p1065_p13 = por %p1064_p12, %p1063_p11 }
  0x53   :  { %527 = vmatpush1.bf16.msra.mxu0 %v921_v27  ;;  %485 = vmatprep.subr.bf16.mxu1 %v922_v28  ;;  %v981_v17 = vld [vmem:[#allocation7 + $0x10] sm:$0xff]   ;;  %v985_v21 = vld [vmem:[#allocation7 + $0x20] sm:$0xff]   ;;  %v986_v22 = vld [vmem:[#allocation7 + $0x68] sm:$0xff]   ;;  %v141_v28 = vlaneseq }
  0x54   :  { %528 = vmatprep.subr.bf16.mxu0 %v924_v29  ;;  %v987_v23 = vld [vmem:[#allocation7 + $0x28] sm:$0xff]   ;;  %v988_v24 = vld [vmem:[#allocation7 + $0x70] sm:$0xff]   ;;  %v990_v26 = vld [vmem:[#allocation7 + $0x78] sm:$0xff]   ;;  %p1066_p0 = pnand %p1065_p13, %p1059_p10 }
  0x55   :  { %v989_v25 = vld [vmem:[#allocation7 + $0x30] sm:$0xff]   ;;  %v991_v27 = vld [vmem:[#allocation7 + $0x38] sm:$0xff]   ;;  %v142_v29 = vshrl.u32 %v141_v28, 7 }
  0x56   :  { %486 = vmatpush1.bf16.msra.mxu1 %v926_v30 }
  0x57   :  { %529 = vmatpush1.bf16.msra.mxu0 %v927_v31  ;;  %487 = vmatprep.subr.bf16.mxu1 %v928_v32  ;;  %v143_v30 = vsub.s32 0, %v142_v29  ;;  %v139_v31 = vld [vmem:[%s1188_s2] sm:$0x3]  ;;  %v147_v32 = vsub.s32 1, %v142_v29 }
  0x58   :  { %530 = vmatprep.subr.bf16.mxu0 %v930_v33 }
  0x59   :  { %v144_v33 = vrot.slane %v139_v31, %v143_v30 }
  0x5a   :  { %488 = vmatpush1.bf16.msra.mxu1 %v932_v34  ;;  %v148_v34 = vrot.slane %v139_v31, %v147_v32 }
  0x5b   :  { %531 = vmatpush1.bf16.msra.mxu0 %v933_v35  ;;  %489 = vmatprep.subr.bf16.mxu1 %v934_v36 }
  0x5c   :  { %532 = vmatprep.subr.bf16.mxu0 %v936_v37 }
  0x5e   :  { %490 = vmatpush1.bf16.msra.mxu1 %v938_v38 }
  0x5f   :  { %533 = vmatpush1.bf16.msra.mxu0 %v939_v39  ;;  %491 = vmatprep.subr.bf16.mxu1 %v940_v40 }
  0x60   :  { %534 = vmatprep.subr.bf16.mxu0 %v942_v41 }
  0x62   :  { %492 = vmatpush1.bf16.msra.mxu1 %v944_v42 }
  0x63   :  { %535 = vmatpush1.bf16.msra.mxu0 %v945_v43  ;;  %493 = vmatprep.subr.bf16.mxu1 %v946_v44 }
  0x64   :  { %536 = vmatprep.subr.bf16.mxu0 %v948_v45 }
  0x66   :  { %494 = vmatpush1.bf16.msra.mxu1 %v950_v50 }
  0x67   :  { %537 = vmatpush1.bf16.msra.mxu0 %v951_v51  ;;  %495 = vmatprep.subr.bf16.mxu1 %v952_v52 }
  0x68   :  { %538 = vmatprep.subr.bf16.mxu0 %v954_v55 }
  0x6a   :  { %496 = vmatpush1.bf16.msra.mxu1 %v956_v56 }
  0x6b   :  { %539 = vmatpush1.bf16.msra.mxu0 %v957_v57  ;;  %497 = vmatprep.subr.bf16.mxu1 %v958_v58  ;;  %v823_v58 = vld [vmem:[%s1190_s4] ss:$0 sm:$0xff] }
  0x6c   :  { %540 = vmatprep.subr.bf16.mxu0 %v960_v59 }
  0x6e   :  { %498 = vmatpush1.bf16.msra.mxu1 %v962_v60 }
  0x6f   :  { %541 = vmatpush1.bf16.msra.mxu0 %v963_v61  ;;  %499 = vmatprep.subr.bf16.mxu1 %v964_v62 }
  0x70   :  { %542 = vmatprep.subr.bf16.mxu0 %v966_v63 }
  0x72   :  { %500 = vmatpush1.bf16.msra.mxu1 %v968_v0 }
  0x73   :  { %543 = vmatpush1.bf16.msra.mxu0 %v969_v1  ;;  %501 = vmatprep.subr.bf16.mxu1 %v970_v2 }
  0x74   :  { %544 = vmatprep.subr.bf16.mxu0 %v972_v3 }
  0x76   :  { %502 = vmatpush1.bf16.msra.mxu1 %v974_v4 }
  0x77   :  { %545 = vmatpush1.bf16.msra.mxu0 %v975_v5  ;;  %840 = vmatprep.subr.bf16.mxu1 %v976_v10 }
  0x79   :  { %504 = vmatmul.mubr.bf16.vlgmr.msra.gmra.mrb[0].mxu1 %v71_v11 }
  0x7a   :  { %547 = vmatmul.mubr.bf16.vlgmr.msra.gmra.mrb[0].mxu0 %v73_v12  ;;  %841 = vmatpush3.bf16.msra.mxu1 %v977_v13 }
  0x7b   :  { %842 = vmatprep.subr.bf16.mxu1 %v978_v14 }
  0x7e   :  { %843 = vmatpush3.bf16.msra.mxu1 %v979_v15 }
  0x7f   :  { %844 = vmatprep.subr.bf16.mxu1 %v980_v16 }
  0x82   :  { %845 = vmatpush3.bf16.msra.mxu1 %v981_v17 }
  0x83   :  { %846 = vmatprep.subr.bf16.mxu1 %v982_v18 }
  0x86   :  { %847 = vmatpush3.bf16.msra.mxu1 %v983_v19 }
  0x87   :  { %848 = vmatprep.subr.bf16.mxu1 %v984_v20 }
  0x8a   :  { %849 = vmatpush3.bf16.msra.mxu1 %v985_v21 }
  0x8b   :  { %850 = vmatprep.subr.bf16.mxu1 %v986_v22 }
  0x8e   :  { %851 = vmatpush3.bf16.msra.mxu1 %v987_v23 }
  0x8f   :  { %852 = vmatprep.subr.bf16.mxu1 %v988_v24 }
  0x92   :  { %853 = vmatpush3.bf16.msra.mxu1 %v989_v25 }
  0x93   :  { %854 = vmatprep.subr.bf16.mxu1 %v990_v26 }
  0x96   :  { %855 = vmatpush3.bf16.msra.mxu1 %v991_v27 }
 0x14c   :  { %v505_v35 = vpop.f32.mrb[0].mxu1 }
 0x14d   :  { %v548_v36 = vpop.f32.mrb[0].mxu0  ;;  %v506_v37 = vadd.f32 %v505_v35, %v144_v33  ;;  %v507_v38 = vpop.f32.mrb[1].mxu1 }
 0x14e   :  { %v550_v39 = vpop.f32.mrb[1].mxu0  ;;  %v508_v40 = vadd.f32 %v507_v38, %v148_v34  ;;  %v509_v41 = vpop.f32.mrb[2].mxu1 }
 0x14f   :  { %v552_v42 = vpop.f32.mrb[2].mxu0  ;;  %v549_v43 = vadd.f32 %v548_v36, %v506_v37  ;;  %v510_v44 = vadd.f32 %v509_v41, %v144_v33  ;;  %v511_v45 = vpop.f32.mrb[3].mxu1 }
 0x150   :  { %v554_v46 = vpop.f32.mrb[3].mxu0  ;;  %v551_v47 = vadd.f32 %v550_v39, %v508_v40  ;;  %v512_v48 = vadd.f32 %v511_v45, %v148_v34 }
 0x151   :  { %v553_v49 = vadd.f32 %v552_v42, %v510_v44  ;;  %v557_v51 = vmax.f32 %v549_v43, 0.0 }
 0x152   :  { %v555_v50 = vadd.f32 %v554_v46, %v512_v48  ;;  %v558_v53 = vmax.f32 %v551_v47, 0.0 }
 0x153   :  { %v559_v52 = vmax.f32 %v553_v49, 0.0 }
 0x154   :  { %v560_v54 = vmax.f32 %v555_v50, 0.0 }
 0x155   :  { %v561_v55 = vpack.c.bf16 %v559_v52, %v557_v51 }
 0x156   :  { %v562_v56 = vpack.c.bf16 %v560_v54, %v558_v53 }
 0x158   :  { %730 = vmatprep.mubr.bf16.mxu1 %v562_v56 }
 0x159   :  { %731 = vmatmul.mubr.bf16.vlgmr.msra.gmra.mrb[4].mxu1 %v561_v55 }
 0x22c   :  { %v856_v57 = vpop.f32.mrb[4].mxu1 }
 0x22d   :  { %v857_v59 = vpop.f32.mrb[5].mxu1 }
 0x22e   :  { %v858_v60 = vadd.f32 %v857_v59, %v856_v57  ;;  %v859_v61 = vpop.f32.mrb[6].mxu1 }
 0x22f   :  { %v860_v62 = vpop.f32.mrb[7].mxu1 }
 0x230   :  { %v733_v63 = vadd.f32 %v858_v60, %v823_v58  ;;  %v861_v0 = vadd.f32 %v860_v62, %v859_v61 }
 0x232   :  { %739 = vst [vmem:[#allocation8] sm:$0xff] %v733_v63  ;;  %v736_v1 = vadd.f32 %v861_v0, %v823_v58 }
 0x234   :  { %740 = vst [vmem:[#allocation8 + $0x8] sm:$0xff] %v736_v1 }
 0x235   :  { %1069 = shalt.err (!%p1066_p0)
}
 0x236   :  { %s1070_s16 = scalar_lea.hbm %s1191_s5, 256 }
 0x237   :  { %p1071_p1 = scmp.ne.s32.totalorder %s1191_s5, %s1070_s16  ;;  %p1074_p2 = scmp.lt.u32.totalorder %s1070_s16, %s1191_s5 }
 0x239   :  { %p1076_p3 = pnand %p1074_p2, %p1071_p1 }
 0x23b   :  { %1079 = shalt.err (!%p1076_p3)
}
 0x23c   :  { %752 = dma.vmem_to_hbm [thread:$0]  %s747_s13, 256, %s1191_s5, [#allocation4], %s1087_s28, %s1087_s28, %s1088_s29  }
 0x23d   :  { %1084 = dma.done.wait [#allocation4], 256  }
 0x23e   :  { %1085 = vsyncadd [#allocation4], 4294967040 }
 0x23f   :  { %756 = vsyncpa [#allocation3], 1 }
 0x240   :  { %757 = vsyncpa [#allocation6], 1 }
 0x241   :  { %758 = vsyncpa [#allocation4], 1 }

</bundles_post_ra>
